<compile_context>
chip_gen: v5e
topology: v5e:2x2
jax: 0.10.0
libtpu: 0.0.40
codegen_flags: <defaults>
</compile_context>

<pallas_src>
import numpy as np

import jax
import jax.numpy as jnp
from jax.experimental import pallas as pl
from jax.experimental.pallas import tpu as pltpu


def _drop_path_kernel(scale_ref, x_ref, o_ref):
    # scale_ref: (TB, 1) f32 per-sample scale; x_ref/o_ref: (TB, TN).
    o_ref[...] = (x_ref[...].astype(jnp.float32) * scale_ref[...]).astype(o_ref.dtype)


def _drop_path_add_kernel(scale_ref, x_ref, r_ref, o_ref):
    # Fused residual add: o = x * scale + r  (one HBM pass over each operand).
    o_ref[...] = (x_ref[...].astype(jnp.float32) * scale_ref[...]
                  + r_ref[...].astype(jnp.float32)).astype(o_ref.dtype)


def _round_up(v, m):
    return ((v + m - 1) // m) * m


def _pick_block(B, F, itemsize, target_bytes=4 * 1024 * 1024):
    """Pick a (TB, TN) block for the flat (B, F) view.

    * TB covers all samples when cheap (rounded to the dtype's sublane pack)
      so the batch axis never forces tiny tiles.
    * TN is a multiple of 128 lanes, sized so one block is ~target_bytes and
      hard-capped: (in + out [+ res]) x 2 pipeline buffers stay well under the
      scoped-VMEM limit on every generation (incl. v7x's 64 MiB physical VMEM).
    * The grid uses pl.cdiv — ragged tails are masked by Pallas, so no
      host-side pad / slice copies of the payload are needed.
    """
    sublane = {4: 8, 2: 16, 1: 32}.get(itemsize, 8)
    TB = _round_up(B, sublane)
    # Don't let a huge batch blow the budget even at the minimum 128-lane tile.
    max_tb = max(sublane, (target_bytes // (128 * itemsize)) // sublane * sublane)
    TB = min(TB, max_tb)
    TN = max(128, (target_bytes // (TB * itemsize)) // 128 * 128)
    TN = min(TN, _round_up(max(F, 1), 128))
    return TB, TN


def drop_path_pallas(x, drop_prob: float, key, training: bool = True,
                     scale_by_keep: bool = True, residual=None,
                     donate: bool = False):
    """Pallas equivalent of timm/segformer drop_path().

    If `residual` is given, returns `residual + drop_path(x)` fused in one
    kernel (saves a full HBM round-trip versus a separate add).
    If `donate=True`, x's flat buffer is aliased to the output.
    """
    if drop_prob == 0.0 or not training:
        return x if residual is None else x + residual

    keep_prob = 1.0 - drop_prob
    orig_shape = x.shape
    B = x.shape[0]
    F = int(np.prod(x.shape[1:])) if x.ndim > 1 else 1

    # Per-sample keep decision + scale, computed once in the wrapper (B scalars).
    keep = jax.random.bernoulli(key, p=keep_prob, shape=(B,))
    scale_val = (1.0 / keep_prob) if (scale_by_keep and keep_prob > 0.0) else 1.0
    scale = jnp.where(keep, jnp.float32(scale_val), jnp.float32(0.0)).reshape(B, 1)

    xf = x.reshape(B, F)                       # free reshape, no copy
    itemsize = jnp.dtype(x.dtype).itemsize
    TB, TN = _pick_block(B, F, itemsize)
    grid = (pl.cdiv(B, TB), pl.cdiv(F, TN))

    scale_spec = pl.BlockSpec((TB, 1), lambda i, j: (i, 0))
    data_spec = pl.BlockSpec((TB, TN), lambda i, j: (i, j))

    if residual is None:
        kernel = _drop_path_kernel
        operands = (scale, xf)
        in_specs = [scale_spec, data_spec]
        n_passes = 2
    else:
        kernel = _drop_path_add_kernel
        operands = (scale, xf, residual.reshape(B, F))
        in_specs = [scale_spec, data_spec, data_spec]
        n_passes = 3

    out = pl.pallas_call(
        kernel,
        out_shape=jax.ShapeDtypeStruct((B, F), x.dtype),
        grid=grid,
        in_specs=in_specs,
        out_specs=data_spec,
        compiler_params=pltpu.CompilerParams(
            dimension_semantics=("parallel", "parallel"),
            vmem_limit_bytes=32 * 1024 * 1024),
        cost_estimate=pl.CostEstimate(
            flops=n_passes * B * F,
            transcendentals=0,
            bytes_accessed=n_passes * B * F * itemsize + 4 * B),
        input_output_aliases={1: 0} if donate else {},
    )(*operands)

    return out.reshape(orig_shape)


class DropPath:
    """Mirror of the PyTorch DropPath module (stochastic depth)."""

    def __init__(self, drop_prob=None, scale_by_keep=True):
        self.drop_prob = drop_prob if drop_prob is not None else 0.0
        self.scale_by_keep = scale_by_keep
        self.training = True

    def __call__(self, x, key=None):
        # NOTE: callers should thread a fresh PRNG key per layer / step; a
        # fixed default key reuses the same keep mask across calls (the
        # per-call semantics still match PyTorch's drop_path).
        if key is None:
            key = jax.random.PRNGKey(0)
        return drop_path_pallas(x, self.drop_prob, key,
                                training=self.training,
                                scale_by_keep=self.scale_by_keep)


if __name__ == "__main__":
    root = jax.random.PRNGKey(0)
    x_key, mask_key = jax.random.split(root)
    keep_prob = 0.9

    # NCHW input, consistent with the PyTorch conv convention: (B=2, C=4, H=16, W=16)
    x = jax.random.normal(x_key, (2, 4, 16, 16), dtype=jnp.float32)

    mod = DropPath(drop_prob=0.1, scale_by_keep=True)
    mod.training = True
    y = jax.block_until_ready(mod(x, key=mask_key))

    # Reference uses the exact same Bernoulli draw as the wrapper (same key).
    keep = np.asarray(jax.random.bernoulli(mask_key, p=keep_prob, shape=(x.shape[0],)))
    expected = np.where(keep[:, None, None, None], np.asarray(x) / keep_prob, 0.0)
    assert np.allclose(np.asarray(y), expected, rtol=1e-5, atol=1e-5)

    # Eval mode / drop_prob=0 path is the identity (matches PyTorch).
    mod.training = False
    y_eval = jax.block_until_ready(mod(x, key=mask_key))
    assert np.allclose(np.asarray(y_eval), np.asarray(x))
    mod.training = True

    # Non-128-aligned payload: handled by the cdiv grid's masked tail (no pad/slice).
    x2 = jax.random.normal(jax.random.PRNGKey(1), (2, 3, 5, 7), dtype=jnp.float32)
    y2 = jax.block_until_ready(mod(x2, key=mask_key))
    keep2 = np.asarray(jax.random.bernoulli(mask_key, p=keep_prob, shape=(x2.shape[0],)))
    exp2 = np.where(keep2[:, None, None, None], np.asarray(x2) / keep_prob, 0.0)
    assert np.allclose(np.asarray(y2), exp2, rtol=1e-5, atol=1e-5)

    # bf16 payload exercises the dtype-aware sublane packing + f32 compute.
    x_bf = x.astype(jnp.bfloat16)
    y_bf = jax.block_until_ready(mod(x_bf, key=mask_key))
    exp_bf = np.where(keep[:, None, None, None],
                      np.asarray(x_bf, dtype=np.float32) / keep_prob, 0.0)
    assert np.allclose(np.asarray(y_bf, dtype=np.float32), exp_bf, rtol=2e-2, atol=2e-2)

    # Fused residual add: residual + drop_path(x) in one pass.
    skip = jax.random.normal(jax.random.PRNGKey(2), x.shape, dtype=jnp.float32)
    y3 = jax.block_until_ready(
        drop_path_pallas(x, 0.1, mask_key, training=True, residual=skip))
    assert np.allclose(np.asarray(y3), np.asarray(skip) + expected,
                       rtol=1e-5, atol=1e-5)

    print("KERNEL_OK")
</pallas_src>

<mosaic_0001>
module attributes {stable_mosaic.version = 11 : i64} {
  func.func @_drop_path_kernel(%arg0: i32, %arg1: i32, %arg2: memref<8x1xf32, #tpu.memory_space<vmem>>, %arg3: memref<8x1024xf32, #tpu.memory_space<vmem>>, %arg4: memref<8x1024xf32, #tpu.memory_space<vmem>>) attributes {dimension_semantics = [#tpu.dimension_semantics<parallel>, #tpu.dimension_semantics<parallel>], iteration_bounds = array<i64: 1, 1>, scalar_prefetch = 0 : i64, scratch_operands = 0 : i64, tpu.core_type = #tpu.core_type<tc>, window_params = [{transform_indices = @transform_0, window_bounds = array<i64: 8, 1>}, {transform_indices = @transform_1, window_bounds = array<i64: 8, 1024>}, {transform_indices = @transform_2, window_bounds = array<i64: 8, 1024>}]} {
    %c0 = arith.constant 0 : index
    %c0_0 = arith.constant 0 : index
    %0 = vector.load %arg3[%c0, %c0_0] : memref<8x1024xf32, #tpu.memory_space<vmem>>, vector<8x1024xf32>
    %c0_1 = arith.constant 0 : index
    %c0_2 = arith.constant 0 : index
    %1 = vector.load %arg2[%c0_1, %c0_2] : memref<8x1xf32, #tpu.memory_space<vmem>>, vector<8x1xf32>
    %2 = vector.broadcast %1 : vector<8x1xf32> to vector<8x1024xf32>
    %3 = arith.mulf %0, %2 : vector<8x1024xf32>
    %c0_3 = arith.constant 0 : index
    %c0_4 = arith.constant 0 : index
    %4 = vector.load %arg4[%c0_3, %c0_4] : memref<8x1024xf32, #tpu.memory_space<vmem>>, vector<8x1024xf32>
    tpu.vector_store %arg4[%c0_3, %c0_4], %3 {strides = array<i32>} : memref<8x1024xf32, #tpu.memory_space<vmem>>, vector<8x1024xf32>,
    return
  }
  func.func @transform_0(%arg0: i32, %arg1: i32) -> (i32, i32) {
    %c0_i32 = arith.constant 0 : i32
    %c0_i32_0 = arith.constant 0 : i32
    return %arg0, %c0_i32 : i32, i32
  }
  func.func @transform_1(%arg0: i32, %arg1: i32) -> (i32, i32) {
    %c0_i32 = arith.constant 0 : i32
    return %arg0, %arg1 : i32, i32
  }
  func.func @transform_2(%arg0: i32, %arg1: i32) -> (i32, i32) {
    %c0_i32 = arith.constant 0 : i32
    return %arg0, %arg1 : i32, i32
  }
}

</mosaic_0001>

<bundles_post_ra>
// kernel: tpu_custom_call.1
= control target key start
LH: loop header
LB: loop body
LE: loop exit
PB: predicated region body
PF: predicated region fallthrough
CT: control target
= control target key end

     0   :  { %7 = vsyncpa [#allocation3], 0  ;;  %s197_s0 = inlined_call_operand.vmem [shape: f32[2,1], index: 0, kind: input, shape index: {}]   ;;  %s198_s1 = inlined_call_operand.hbm [shape: f32[2,1024], index: 1, kind: input, shape index: {}]   ;;  %s199_s2 = inlined_call_operand.hbm [shape: f32[2,1024], index: 2, kind: output, shape index: {}]  }
   0x1   :  { %8 = vsyncpa [#allocation4], 0 }
   0x2   :  { %14 = vsyncadd [#allocation3], 768  ;;  %s15_s11 = sshll.u32 %s198_s1, 4  ;;  %s158_s12 = smov [#allocation2]   ;;  %s16_s11 = int_to_ptr.hbm [resolvable:$true] %s15_s11 }
   0x3   :  { %s17_s13 = sshll.u32 %s158_s12, 4  ;;  %s159_s14 = smov 256   ;;  %s18_s13 = int_to_ptr.vmem [resolvable:$true] %s17_s13 }
   0x4   :  { %s160_s15 = smov 16  }
   0x5   :  { %23 = dma.hbm_to_vmem [thread:$0]  %s16_s11, 256, %s18_s13, [#allocation3], %s159_s14, %s159_s14, %s160_s15  }
   0x6   :  { %154 = dma.done.wait [#allocation3], 1024  }
   0x7   :  { %155 = vsyncadd [#allocation3], 4294966272  ;;  %v161_v0 = vmov 0   ;;  %v36_v1 = vld [vmem:[%s197_s0] sm:$0xff]  ;;  %v162_v2 = vmov 269488144  }
   0x8   :  { %105 = vset.pattern.permute.xlu0 %v161_v0  ;;  %v42_v3 = vunpack.c.l.s4 %v162_v2  ;;  %v163_v4 = vmov 842150450   ;;  %v164_v6 = vmov 1414812756   ;;  %v165_v8 = vmov 1987475062  }
   0x9   :  { %39 = vperm.xlu0 %105, %v36_v1   ;;  %v46_v5 = vunpack.c.l.s4 %v163_v4  ;;  %v50_v7 = vunpack.c.l.s4 %v164_v6  ;;  %v54_v9 = vunpack.c.l.s4 %v165_v8  ;;  %v28_v15 = vld [vmem:[#allocation2] sm:$0xff]  ;;  %v29_v16 = vld [vmem:[#allocation2 + $0x8] sm:$0xff]  ;;  %v30_v17 = vld [vmem:[#allocation2 + $0x10] sm:$0xff] }
   0xa   :  { %v43_v10 = vunpack.c.0.s8 %v42_v3  ;;  %v31_v18 = vld [vmem:[#allocation2 + $0x18] sm:$0xff]  ;;  %v32_v22 = vld [vmem:[#allocation2 + $0x20] sm:$0xff]  ;;  %v33_v23 = vld [vmem:[#allocation2 + $0x28] sm:$0xff] }
   0xb   :  { %v47_v11 = vunpack.c.0.s8 %v46_v5  ;;  %v51_v12 = vunpack.c.0.s8 %v50_v7  ;;  %v55_v13 = vunpack.c.0.s8 %v54_v9  ;;  %v34_v28 = vld [vmem:[#allocation2 + $0x30] sm:$0xff]  ;;  %v35_v30 = vld [vmem:[#allocation2 + $0x38] sm:$0xff] }
  0x7b   :  { %v40_v14 = vpop.permute.xlu0 %39 }
  0x7c   :  { %v44_v19 = vperm.slane %v40_v14, %v43_v10  ;;  %v48_v20 = vperm.slane %v40_v14, %v47_v11  ;;  %v52_v21 = vperm.slane %v40_v14, %v51_v12  ;;  %v56_v24 = vperm.slane %v40_v14, %v55_v13 }
  0x7e   :  { %v61_v25 = vmul.f32 %v44_v19, %v28_v15  ;;  %v62_v26 = vmul.f32 %v44_v19, %v29_v16  ;;  %v63_v27 = vmul.f32 %v48_v20, %v30_v17  ;;  %v64_v29 = vmul.f32 %v48_v20, %v31_v18 }
  0x7f   :  { %v65_v31 = vmul.f32 %v52_v21, %v32_v22  ;;  %v66_v32 = vmul.f32 %v52_v21, %v33_v23  ;;  %v67_v33 = vmul.f32 %v56_v24, %v34_v28  ;;  %v68_v34 = vmul.f32 %v56_v24, %v35_v30 }
  0x80   :  { %69 = vst [vmem:[#allocation5] sm:$0xff] %v61_v25 }
  0x81   :  { %70 = vst [vmem:[#allocation5 + $0x8] sm:$0xff] %v62_v26 }
  0x82   :  { %71 = vst [vmem:[#allocation5 + $0x10] sm:$0xff] %v63_v27 }
  0x83   :  { %72 = vst [vmem:[#allocation5 + $0x18] sm:$0xff] %v64_v29 }
  0x84   :  { %73 = vst [vmem:[#allocation5 + $0x20] sm:$0xff] %v65_v31 }
  0x85   :  { %74 = vst [vmem:[#allocation5 + $0x28] sm:$0xff] %v66_v32 }
  0x86   :  { %75 = vst [vmem:[#allocation5 + $0x30] sm:$0xff] %v67_v33 }
  0x87   :  { %76 = vst [vmem:[#allocation5 + $0x38] sm:$0xff] %v68_v34 }
  0x88   :  { %80 = vsyncadd [#allocation4], 768  ;;  %s83_s18 = sshll.u32 %s199_s2, 4  ;;  %s166_s19 = smov [#allocation5]   ;;  %s84_s18 = int_to_ptr.hbm [resolvable:$true] %s83_s18 }
  0x89   :  { %s81_s20 = sshll.u32 %s166_s19, 4  ;;  %s82_s20 = int_to_ptr.vmem [resolvable:$true] %s81_s20 }
  0x8a   :  { %89 = dma.vmem_to_hbm [thread:$0]  %s82_s20, 256, %s84_s18, [#allocation4], %s159_s14, %s159_s14, %s160_s15  }
  0x8b   :  { %156 = dma.done.wait [#allocation4], 1024  }
  0x8c   :  { %157 = vsyncadd [#allocation4], 4294966272 }
  0x8d   :  { %94 = vsyncpa [#allocation3], 1 }
  0x8e   :  { %95 = vsyncpa [#allocation4], 1 }

</bundles_post_ra>
